<compile_context>
chip_gen: v7x
topology: tpu7x:2x2x1
jax: 0.10.0
libtpu: 0.0.40
codegen_flags: <defaults>
</compile_context>

<pallas_src>
import math

import jax
import jax.numpy as jnp
import numpy as np
from jax.experimental import pallas as pl
from jax.experimental.pallas import tpu as pltpu


def _round_up(x, m):
    return ((x + m - 1) // m) * m


# ----------------------------------------------------------------------------
# Fused kernel: in-kernel embedding lookup + 3-layer MLP head (feature-major)
#   idx : [n_rows_pad, TB] int32  (row c = column-c indices of this batch tile)
#   tbl : [E_pad, V_tot]   bf16   block-diagonal packing of all column tables
#   w1  : [H_pad, E_pad]   bf16   h1 = relu(W1 @ x + b1)
#   w2  : [H_pad, H_pad]   bf16   h2 = relu(W2 @ h1 + b2)
#   w3  : [H_pad, 1]       f32    logit = sum_h(h2 * w3) + b3
#   out : [1, TB]          f32    sigmoid(logit)   -- lane-dense store
# ----------------------------------------------------------------------------
def _make_fused_kernel(v_pads):
    def kernel(idx_ref, tbl_ref, w1_ref, b1_ref, w2_ref, b2_ref, w3_ref,
               b3_ref, out_ref):
        tb = idx_ref.shape[1]

        # ---- in-kernel embedding lookup -----------------------------------
        # Per column c: one-hot[v, b] = (v == idx[c, b]) over its padded vocab
        # (multiple of 128).  Concatenating the per-column one-hots in block
        # order and multiplying by the block-diagonal table performs the
        # lookup + concat of the original module exactly (0/1 weights).
        onehots = []
        for c, vp in enumerate(v_pads):           # static, tiny Python loop
            row = idx_ref[c:c + 1, :]                                 # [1, TB]
            iota = jax.lax.broadcasted_iota(jnp.int32, (vp, 1), 0)    # [vp, 1]
            onehots.append((iota == row).astype(jnp.bfloat16))        # [vp,TB]
        mh = jnp.concatenate(onehots, axis=0)                     # [V_tot, TB]

        x = jnp.dot(tbl_ref[...], mh,
                    preferred_element_type=jnp.float32)           # [E_pad, TB]
        x = x.astype(jnp.bfloat16)   # exact: each element is one table value

        # ---- MLP head (bf16 operands, f32 accumulation) -------------------
        h1 = jnp.dot(w1_ref[...], x, preferred_element_type=jnp.float32)
        h1 = jnp.maximum(h1 + b1_ref[...], 0.0)                   # [H_pad, TB]
        h2 = jnp.dot(w2_ref[...], h1.astype(jnp.bfloat16),
                     preferred_element_type=jnp.float32)
        h2 = jnp.maximum(h2 + b2_ref[...], 0.0)                   # [H_pad, TB]

        # Final 10 -> 1 layer: VPU multiply + sublane (XLU) reduction; avoids
        # an N=1 MXU matmul and is already lane-dense [1, TB].
        logit = jnp.sum(h2 * w3_ref[...], axis=0, keepdims=True) + b3_ref[...]
        out_ref[...] = jax.nn.sigmoid(logit)                      # [1, TB]
    return kernel


def neural_cf_forward(idx_t, tbl, w1, b1, w2, b2, w3, b3, *, tb, v_pads):
    """idx_t: [n_rows_pad, B_pad] int32 -> [1, B_pad] f32 sigmoid outputs."""
    n_rows, b_pad = idx_t.shape
    num_tiles = b_pad // tb

    def resident(a):   # same block every grid step -> stays VMEM-resident
        return pl.BlockSpec(a.shape, lambda i: (0,) * a.ndim)

    return pl.pallas_call(
        _make_fused_kernel(v_pads),
        out_shape=jax.ShapeDtypeStruct((1, b_pad), jnp.float32),
        grid=(num_tiles,),
        in_specs=[pl.BlockSpec((n_rows, tb), lambda i: (0, i)),   # streamed idx
                  resident(tbl), resident(w1), resident(b1),
                  resident(w2), resident(b2), resident(w3), resident(b3)],
        out_specs=pl.BlockSpec((1, tb), lambda i: (0, i)),
        compiler_params=pltpu.CompilerParams(
            dimension_semantics=("parallel",),        # megacore-shard batch
            vmem_limit_bytes=40 * 1024 * 1024),       # headroom for TB=8192
    )(idx_t, tbl, w1, b1, w2, b2, w3, b3)


# ----------------------------------------------------------------------------
# Model (parameter construction + glue)
# ----------------------------------------------------------------------------
class NeuralCFEarlyCross:
    H = 10         # hidden width of linear1/linear2 (as in the PyTorch module)
    H_PAD = 16     # padded to a sublane-friendly size
    TB_MAX = 8192  # batch-tile cap (review: sweep 4096-16384)

    def __init__(self, sparse_col_size, key):
        self.sparse_col_size = list(sparse_col_size)
        n_cols = len(self.sparse_col_size)
        # embedding_size = int(6 * class_size ** 0.25), as in the PyTorch module
        self.embedding_size = [int(6 * math.pow(c, 0.25))
                               for c in self.sparse_col_size]
        self.total_embedding_size = int(np.sum(self.embedding_size))
        self.e_pad = _round_up(self.total_embedding_size, 16)

        keys = jax.random.split(key, n_cols + 6)

        # f32 master copies (nn.Embedding default init: N(0, 1)), stored
        # transposed [embed, vocab] so the gather lands feature-major.
        self.embedding_tables_t = [
            jax.random.normal(keys[i], (e, c), dtype=jnp.float32)
            for i, (c, e) in enumerate(zip(self.sparse_col_size,
                                           self.embedding_size))
        ]

        def linear_params(k_w, k_b, fan_in, fan_out):
            # nn.Linear default init: U(-1/sqrt(fan_in), 1/sqrt(fan_in))
            bound = 1.0 / math.sqrt(fan_in)
            w = jax.random.uniform(k_w, (fan_out, fan_in), jnp.float32,
                                   -bound, bound)     # torch layout [out, in]
            b = jax.random.uniform(k_b, (fan_out,), jnp.float32, -bound, bound)
            return w, b

        off = n_cols
        self.w1, self.b1 = linear_params(keys[off + 0], keys[off + 1],
                                         self.total_embedding_size, self.H)
        self.w2, self.b2 = linear_params(keys[off + 2], keys[off + 3],
                                         self.H, self.H)
        self.w3, self.b3 = linear_params(keys[off + 4], keys[off + 5],
                                         self.H, 1)

        # ---- kernel-layout parameters -------------------------------------
        # Per-column vocab padded to a multiple of 128 lanes; all tables packed
        # block-diagonally into one VMEM-resident bf16 matrix so the in-kernel
        # lookup + concat is a single  tbl_blk @ multi_hot  MXU matmul.
        # TODO(synk): for large vocabularies the resident table / one-hot path
        # doesn't scale; switch to a pl.Element / manual-DMA row gather.
        self.v_pad = [_round_up(c, 128) for c in self.sparse_col_size]
        self.v_off = np.concatenate([[0], np.cumsum(self.v_pad)]).astype(int)
        self.e_off = np.concatenate([[0],
                                     np.cumsum(self.embedding_size)]).astype(int)
        v_tot = int(self.v_off[-1])

        tbl = jnp.zeros((self.e_pad, v_tot), jnp.float32)
        for i, t in enumerate(self.embedding_tables_t):
            e, v = t.shape
            tbl = tbl.at[self.e_off[i]:self.e_off[i] + e,
                         self.v_off[i]:self.v_off[i] + v].set(t)
        self.tbl_k = tbl.astype(jnp.bfloat16)

        # Zero-padded, bf16 weights (MXU native bf16 x bf16 -> f32 path); the
        # padded rows/cols are zero so padded hidden units stay exactly 0
        # through ReLU and never affect the valid outputs.  Biases stay f32.
        E, Ep, H, Hp = (self.total_embedding_size, self.e_pad,
                        self.H, self.H_PAD)
        self.w1_k = (jnp.zeros((Hp, Ep), jnp.float32)
                     .at[:H, :E].set(self.w1).astype(jnp.bfloat16))
        self.b1_k = jnp.zeros((Hp, 1), jnp.float32).at[:H, 0].set(self.b1)
        self.w2_k = (jnp.zeros((Hp, Hp), jnp.float32)
                     .at[:H, :H].set(self.w2).astype(jnp.bfloat16))
        self.b2_k = jnp.zeros((Hp, 1), jnp.float32).at[:H, 0].set(self.b2)
        self.w3_k = jnp.zeros((Hp, 1), jnp.float32).at[:H, 0].set(self.w3[0])
        self.b3_k = jnp.asarray(self.b3, jnp.float32).reshape(1, 1)

    def __call__(self, sparse_feature):
        # sparse_feature: int [B, n_cols] (or [n_cols] -> treated as batch 1)
        if sparse_feature.ndim == 1:
            sparse_feature = sparse_feature.reshape(1, -1)
        B, n_cols = sparse_feature.shape
        assert n_cols == len(self.sparse_col_size)

        # Batch tile: large tiles amortize the ~0.35 us/step pipeline overhead;
        # mid-size batches split in two so v7x megacore uses both TensorCores.
        b128 = _round_up(B, 128)
        if b128 <= 128:
            tb = 128
        elif b128 <= 2 * self.TB_MAX:
            tb = _round_up((b128 + 1) // 2, 128)
        else:
            tb = self.TB_MAX
        b_pad = _round_up(B, tb)

        # Only the (tiny) int32 indices cross the pallas_call boundary,
        # feature-major [n_cols, B_pad]; the gather/concat happens in-kernel.
        n_rows = _round_up(n_cols, 8)          # sublane-friendly index layout
        idx_t = (jnp.zeros((n_rows, b_pad), jnp.int32)
                 .at[:n_cols, :B].set(sparse_feature.astype(jnp.int32).T))

        out = neural_cf_forward(idx_t, self.tbl_k, self.w1_k, self.b1_k,
                                self.w2_k, self.b2_k, self.w3_k, self.b3_k,
                                tb=tb, v_pads=tuple(self.v_pad))  # [1, B_pad]
        return out.reshape(-1)[:B]             # view(-1), drop batch padding


# ----------------------------------------------------------------------------
# Reference (pure JAX, f32 / unpadded parameters, HIGHEST precision)
# ----------------------------------------------------------------------------
def reference_forward(model, sparse_feature):
    if sparse_feature.ndim == 1:
        sparse_feature = sparse_feature.reshape(1, -1)
    emb = jnp.concatenate(
        [jnp.take(model.embedding_tables_t[i], sparse_feature[:, i], axis=1).T
         for i in range(sparse_feature.shape[1])], axis=1)          # [B, E] f32
    hp = jax.lax.Precision.HIGHEST
    h1 = jax.nn.relu(jnp.dot(emb, model.w1.T, precision=hp) + model.b1)
    h2 = jax.nn.relu(jnp.dot(h1, model.w2.T, precision=hp) + model.b2)
    logit = jnp.dot(h2, model.w3.T, precision=hp) + model.b3
    return jax.nn.sigmoid(logit).reshape(-1)


if __name__ == "__main__":
    key = jax.random.PRNGKey(0)
    k_param, k_data = jax.random.split(key)

    # Small, deterministic shapes: 3 sparse columns, batch of 8.
    sparse_col_size = [100, 50, 30]          # vocab sizes per column
    batch = 8

    model = NeuralCFEarlyCross(sparse_col_size, k_param)

    data_keys = jax.random.split(k_data, len(sparse_col_size))
    cols = [jax.random.randint(data_keys[i], (batch,), 0, c, dtype=jnp.int32)
            for i, c in enumerate(sparse_col_size)]
    sparse_feature = jnp.stack(cols, axis=1)     # [batch, n_cols] int32

    out = jax.block_until_ready(model(sparse_feature))
    ref = jax.block_until_ready(reference_forward(model, sparse_feature))

    # Kernel runs the bf16 MXU path (tables/W1/W2 in bf16, f32 accumulation);
    # the reference is full f32 at HIGHEST precision, hence the relaxed tol.
    np.testing.assert_allclose(np.asarray(out), np.asarray(ref),
                               rtol=5e-2, atol=1e-2)
    assert out.shape == (batch,)

    print("KERNEL_OK")
</pallas_src>

<mosaic_0001>
module attributes {stable_mosaic.version = 11 : i64} {
  func.func @kernel(%arg0: i32, %arg1: memref<8x128xi32, #tpu.memory_space<vmem>>, %arg2: memref<48x384xbf16, #tpu.memory_space<vmem>>, %arg3: memref<16x48xbf16, #tpu.memory_space<vmem>>, %arg4: memref<16x1xf32, #tpu.memory_space<vmem>>, %arg5: memref<16x16xbf16, #tpu.memory_space<vmem>>, %arg6: memref<16x1xf32, #tpu.memory_space<vmem>>, %arg7: memref<16x1xf32, #tpu.memory_space<vmem>>, %arg8: memref<1x1xf32, #tpu.memory_space<vmem>>, %arg9: memref<1x128xf32, #tpu.memory_space<vmem>>) attributes {dimension_semantics = [#tpu.dimension_semantics<parallel>], iteration_bounds = array<i64: 1>, scalar_prefetch = 0 : i64, scratch_operands = 0 : i64, tpu.core_type = #tpu.core_type<tc>, window_params = [{transform_indices = @transform_0, window_bounds = array<i64: 8, 128>}, {pipeline_mode = #tpu.pipeline_mode<synchronous>, transform_indices = @transform_1, window_bounds = array<i64: 48, 384>}, {pipeline_mode = #tpu.pipeline_mode<synchronous>, transform_indices = @transform_2, window_bounds = array<i64: 16, 48>}, {pipeline_mode = #tpu.pipeline_mode<synchronous>, transform_indices = @transform_3, window_bounds = array<i64: 16, 1>}, {pipeline_mode = #tpu.pipeline_mode<synchronous>, transform_indices = @transform_4, window_bounds = array<i64: 16, 16>}, {pipeline_mode = #tpu.pipeline_mode<synchronous>, transform_indices = @transform_5, window_bounds = array<i64: 16, 1>}, {pipeline_mode = #tpu.pipeline_mode<synchronous>, transform_indices = @transform_6, window_bounds = array<i64: 16, 1>}, {pipeline_mode = #tpu.pipeline_mode<synchronous>, transform_indices = @transform_7, window_bounds = array<i64: 1, 1>}, {transform_indices = @transform_8, window_bounds = array<i64: 1, 128>}]} {
    %c0 = arith.constant 0 : index
    %c0_0 = arith.constant 0 : index
    %0 = vector.load %arg1[%c0, %c0_0] : memref<8x128xi32, #tpu.memory_space<vmem>>, vector<1x128xi32>
    %1 = tpu.iota {dimensions = array<i32: 0>} : vector<128x1xi32>
    %2 = vector.broadcast %1 : vector<128x1xi32> to vector<128x128xi32>
    %3 = vector.broadcast %0 : vector<1x128xi32> to vector<128x128xi32>
    %4 = arith.cmpi eq, %2, %3 : vector<128x128xi32>
    %5 = arith.extui %4 : vector<128x128xi1> to vector<128x128xi32>
    %6 = arith.sitofp %5 : vector<128x128xi32> to vector<128x128xf32>
    %7 = arith.truncf %6 : vector<128x128xf32> to vector<128x128xbf16>
    %c1 = arith.constant 1 : index
    %c0_1 = arith.constant 0 : index
    %8 = vector.load %arg1[%c1, %c0_1] : memref<8x128xi32, #tpu.memory_space<vmem>>, vector<1x128xi32>
    %9 = tpu.iota {dimensions = array<i32: 0>} : vector<128x1xi32>
    %10 = vector.broadcast %9 : vector<128x1xi32> to vector<128x128xi32>
    %11 = vector.broadcast %8 : vector<1x128xi32> to vector<128x128xi32>
    %12 = arith.cmpi eq, %10, %11 : vector<128x128xi32>
    %13 = arith.extui %12 : vector<128x128xi1> to vector<128x128xi32>
    %14 = arith.sitofp %13 : vector<128x128xi32> to vector<128x128xf32>
    %15 = arith.truncf %14 : vector<128x128xf32> to vector<128x128xbf16>
    %c2 = arith.constant 2 : index
    %c0_2 = arith.constant 0 : index
    %16 = vector.load %arg1[%c2, %c0_2] : memref<8x128xi32, #tpu.memory_space<vmem>>, vector<1x128xi32>
    %17 = tpu.iota {dimensions = array<i32: 0>} : vector<128x1xi32>
    %18 = vector.broadcast %17 : vector<128x1xi32> to vector<128x128xi32>
    %19 = vector.broadcast %16 : vector<1x128xi32> to vector<128x128xi32>
    %20 = arith.cmpi eq, %18, %19 : vector<128x128xi32>
    %21 = arith.extui %20 : vector<128x128xi1> to vector<128x128xi32>
    %22 = arith.sitofp %21 : vector<128x128xi32> to vector<128x128xf32>
    %23 = arith.truncf %22 : vector<128x128xf32> to vector<128x128xbf16>
    %24 = tpu.concatenate %7, %15, %23 in 0 : vector<128x128xbf16>, vector<128x128xbf16>, vector<128x128xbf16> -> vector<384x128xbf16>
    %c0_3 = arith.constant 0 : index
    %c0_4 = arith.constant 0 : index
    %25 = vector.load %arg2[%c0_3, %c0_4] : memref<48x384xbf16, #tpu.memory_space<vmem>>, vector<48x384xbf16>
    %cst = arith.constant dense<0.000000e+00> : vector<48x128xf32>
    %26 = tpu.matmul %25, %24, %cst {dimension_numbers = #tpu.dot_dimension_numbers<[1], [0], [0], [1], [0, 0, 1, 1], [], []>} : vector<48x384xbf16>, vector<384x128xbf16>, vector<48x128xf32> -> vector<48x128xf32>
    %27 = arith.truncf %26 : vector<48x128xf32> to vector<48x128xbf16>
    %c0_5 = arith.constant 0 : index
    %c0_6 = arith.constant 0 : index
    %28 = vector.load %arg3[%c0_5, %c0_6] : memref<16x48xbf16, #tpu.memory_space<vmem>>, vector<16x48xbf16>
    %cst_7 = arith.constant dense<0.000000e+00> : vector<16x128xf32>
    %29 = tpu.matmul %28, %27, %cst_7 {dimension_numbers = #tpu.dot_dimension_numbers<[1], [0], [0], [1], [0, 0, 1, 1], [], []>} : vector<16x48xbf16>, vector<48x128xbf16>, vector<16x128xf32> -> vector<16x128xf32>
    %c0_8 = arith.constant 0 : index
    %c0_9 = arith.constant 0 : index
    %30 = vector.load %arg4[%c0_8, %c0_9] : memref<16x1xf32, #tpu.memory_space<vmem>>, vector<16x1xf32>
    %31 = vector.broadcast %30 : vector<16x1xf32> to vector<16x128xf32>
    %32 = arith.addf %29, %31 : vector<16x128xf32>
    %cst_10 = arith.constant 0.000000e+00 : f32
    %33 = vector.broadcast %cst_10 : f32 to vector<16x128xf32>
    %34 = arith.maximumf %32, %33 : vector<16x128xf32>
    %c0_11 = arith.constant 0 : index
    %c0_12 = arith.constant 0 : index
    %35 = vector.load %arg5[%c0_11, %c0_12] : memref<16x16xbf16, #tpu.memory_space<vmem>>, vector<16x16xbf16>
    %36 = arith.truncf %34 : vector<16x128xf32> to vector<16x128xbf16>
    %cst_13 = arith.constant dense<0.000000e+00> : vector<16x128xf32>
    %37 = tpu.matmul %35, %36, %cst_13 {dimension_numbers = #tpu.dot_dimension_numbers<[1], [0], [0], [1], [0, 0, 1, 1], [], []>} : vector<16x16xbf16>, vector<16x128xbf16>, vector<16x128xf32> -> vector<16x128xf32>
    %c0_14 = arith.constant 0 : index
    %c0_15 = arith.constant 0 : index
    %38 = vector.load %arg6[%c0_14, %c0_15] : memref<16x1xf32, #tpu.memory_space<vmem>>, vector<16x1xf32>
    %39 = vector.broadcast %38 : vector<16x1xf32> to vector<16x128xf32>
    %40 = arith.addf %37, %39 : vector<16x128xf32>
    %cst_16 = arith.constant 0.000000e+00 : f32
    %41 = vector.broadcast %cst_16 : f32 to vector<16x128xf32>
    %42 = arith.maximumf %40, %41 : vector<16x128xf32>
    %c0_17 = arith.constant 0 : index
    %c0_18 = arith.constant 0 : index
    %43 = vector.load %arg7[%c0_17, %c0_18] : memref<16x1xf32, #tpu.memory_space<vmem>>, vector<16x1xf32>
    %44 = vector.broadcast %43 : vector<16x1xf32> to vector<16x128xf32>
    %45 = arith.mulf %42, %44 : vector<16x128xf32>
    %cst_19 = arith.constant dense<0.000000e+00> : vector<128xf32>
    %46 = vector.multi_reduction <add>, %45, %cst_19 [0] : vector<16x128xf32> to vector<128xf32>
    %47 = vector.shape_cast %46 : vector<128xf32> to vector<1x128xf32>
    %c0_20 = arith.constant 0 : index
    %c0_21 = arith.constant 0 : index
    %48 = vector.load %arg8[%c0_20, %c0_21] : memref<1x1xf32, #tpu.memory_space<vmem>>, vector<1x1xf32>
    %49 = vector.broadcast %48 : vector<1x1xf32> to vector<1x128xf32>
    %50 = arith.addf %47, %49 : vector<1x128xf32>
    %51 = arith.negf %50 : vector<1x128xf32>
    %52 = math.exp %51 : vector<1x128xf32>
    %cst_22 = arith.constant 1.000000e+00 : f32
    %53 = vector.broadcast %cst_22 : f32 to vector<1x128xf32>
    %54 = arith.addf %53, %52 : vector<1x128xf32>
    %55 = arith.divf %53, %54 : vector<1x128xf32>
    %c0_23 = arith.constant 0 : index
    %c0_24 = arith.constant 0 : index
    %56 = vector.load %arg9[%c0_23, %c0_24] : memref<1x128xf32, #tpu.memory_space<vmem>>, vector<1x128xf32>
    tpu.vector_store %arg9[%c0_23, %c0_24], %55 {strides = array<i32>} : memref<1x128xf32, #tpu.memory_space<vmem>>, vector<1x128xf32>,
    return
  }
  func.func @transform_0(%arg0: i32) -> (i32, i32) {
    %c0_i32 = arith.constant 0 : i32
    %c0_i32_0 = arith.constant 0 : i32
    return %c0_i32, %arg0 : i32, i32
  }
  func.func @transform_1(%arg0: i32) -> (i32, i32) {
    %c0_i32 = arith.constant 0 : i32
    %c0_i32_0 = arith.constant 0 : i32
    %c0_i32_1 = arith.constant 0 : i32
    return %c0_i32, %c0_i32_0 : i32, i32
  }
  func.func @transform_2(%arg0: i32) -> (i32, i32) {
    %c0_i32 = arith.constant 0 : i32
    %c0_i32_0 = arith.constant 0 : i32
    %c0_i32_1 = arith.constant 0 : i32
    return %c0_i32, %c0_i32_0 : i32, i32
  }
  func.func @transform_3(%arg0: i32) -> (i32, i32) {
    %c0_i32 = arith.constant 0 : i32
    %c0_i32_0 = arith.constant 0 : i32
    %c0_i32_1 = arith.constant 0 : i32
    return %c0_i32, %c0_i32_0 : i32, i32
  }
  func.func @transform_4(%arg0: i32) -> (i32, i32) {
    %c0_i32 = arith.constant 0 : i32
    %c0_i32_0 = arith.constant 0 : i32
    %c0_i32_1 = arith.constant 0 : i32
    return %c0_i32, %c0_i32_0 : i32, i32
  }
  func.func @transform_5(%arg0: i32) -> (i32, i32) {
    %c0_i32 = arith.constant 0 : i32
    %c0_i32_0 = arith.constant 0 : i32
    %c0_i32_1 = arith.constant 0 : i32
    return %c0_i32, %c0_i32_0 : i32, i32
  }
  func.func @transform_6(%arg0: i32) -> (i32, i32) {
    %c0_i32 = arith.constant 0 : i32
    %c0_i32_0 = arith.constant 0 : i32
    %c0_i32_1 = arith.constant 0 : i32
    return %c0_i32, %c0_i32_0 : i32, i32
  }
  func.func @transform_7(%arg0: i32) -> (i32, i32) {
    %c0_i32 = arith.constant 0 : i32
    %c0_i32_0 = arith.constant 0 : i32
    %c0_i32_1 = arith.constant 0 : i32
    return %c0_i32, %c0_i32_0 : i32, i32
  }
  func.func @transform_8(%arg0: i32) -> (i32, i32) {
    %c0_i32 = arith.constant 0 : i32
    %c0_i32_0 = arith.constant 0 : i32
    return %c0_i32, %arg0 : i32, i32
  }
}

</mosaic_0001>

<bundles_post_ra>
// kernel: tpu_custom_call.1
= control target key start
LH: loop header
LB: loop body
LE: loop exit
PB: predicated region body
PF: predicated region fallthrough
CT: control target
= control target key end

     0   :  { %s1135_s0 = inlined_call_operand.vmem [shape: s32[8,128], index: 0, kind: input, shape index: {}]   ;;  %s1136_s1 = inlined_call_operand.hbm [shape: bf16[48,384], index: 1, kind: input, shape index: {}]   ;;  %s1137_s2 = inlined_call_operand.vmem [shape: bf16[16,48], index: 2, kind: input, shape index: {}]   ;;  %s1138_s3 = inlined_call_operand.vmem [shape: f32[16,1], index: 3, kind: input, shape index: {}]   ;;  %s1139_s4 = inlined_call_operand.vmem [shape: bf16[16,16], index: 4, kind: input, shape index: {}]   ;;  %s1140_s5 = inlined_call_operand.vmem [shape: f32[16,1], index: 5, kind: input, shape index: {}]   ;;  %s1141_s6 = inlined_call_operand.vmem [shape: f32[16,1], index: 6, kind: input, shape index: {}]   ;;  %s1142_s7 = inlined_call_operand.<no memory space> [shape: f32[1,1], index: 7, kind: input, shape index: {}]   ;;  %s1143_s8 = inlined_call_operand.hbm [shape: f32[1,128], index: 8, kind: output, shape index: {}]  }
   0x1   :  { %v13_v0 = vstv %s1142_s7 }
   0x2   :  { %14 = vst [vmem:[#allocation2] sm:$0x1] %v13_v0 }
   0x3   :  { %15 = vsyncpa [#allocation4], 0 }
   0x4   :  { %16 = vsyncpa [#allocation5], 0  ;;  %s895_s29 = smov [#allocation3]   ;;  %s847_s11 = scalar_lea.hbm %s1136_s1, 1152 }
   0x5   :  { %s24_s30 = sshll.u32 %s895_s29, 4  ;;  %p848_p0 = scmp.ne.s32.totalorder %s1136_s1, %s847_s11  ;;  %s25_s30 = int_to_ptr.vmem [resolvable:$true] %s24_s30 }
   0x6   :  { %p851_p1 = scmp.lt.u32.totalorder %s847_s11, %s1136_s1 }
   0x8   :  { %p853_p2 = pnand %p851_p1, %p848_p0 }
   0xa   :  { %856 = shalt.err (!%p853_p2)
}
   0xb   :  { %s857_s7 = scalar_lea.vmem %s25_s30, 1152  ;;  %p862_p4 = scmp.lt.s32.totalorder %s25_s30, %s25_s30 }
   0xc   :  { %p858_p3 = scmp.ne.s32.totalorder %s25_s30, %s857_s7  ;;  %p863_p5 = scmp.lt.s32.totalorder %s857_s7, %s857_s7 }
   0xe   :  { %p864_p6 = por %p863_p5, %p862_p4 }
  0x10   :  { %p865_p7 = pnand %p864_p6, %p858_p3 }
  0x12   :  { %868 = shalt.err (!%p865_p7)
}
  0x13   :  { %s896_s16 = smov 192   ;;  %s897_s17 = smov 12  }
  0x14   :  { %30 = dma.hbm_to_vmem [thread:$0]  %s1136_s1, 1152, %s25_s30, [#allocation4], %s896_s16, %s896_s16, %s897_s17  }
  0x15   :  { %891 = dma.done.wait [#allocation4], 1152  }
  0x16   :  { %892 = vsyncadd [#allocation4], 4294966144  ;;  %v48_v1 = vlaneseq  ;;  %v898_v2 = vmov 0.0   ;;  %vm1144_vm0 = vmmov 0   ;;  %v976_v9 = vld [vmem:[%s1135_s0 + $0x1] ss:$0 sm:$0xff] }
  0x17   :  { %775 = vmatprep.subr.bf16.mxu1 %v898_v2  ;;  %791 = vmatprep.mubr.msk.bf16.mxu1 %vm1144_vm0, %v898_v2  ;;  %v981_v10 = vld [vmem:[%s1135_s0] ss:$0 sm:$0xff]  ;;  %v986_v11 = vld [vmem:[%s1135_s0 + $0x2] ss:$0 sm:$0xff]  ;;  %v900_v12 = vmov 1.0|1.0  }
  0x18   :  { %v966_v3 = vshrl.u32 %v48_v1, 7  ;;  %v831_v13 = vld [vmem:[#allocation3 + $0x4] ss:$12 sps:$4 sm:$0xff]   ;;  %v829_v24 = vld [vmem:[#allocation3] ss:$12 sps:$4 sm:$0xff]   ;;  %v901_v33 = vmov 0  }
  0x19   :  { %339 = vmatprep.mubr.bf16.mxu0 %v831_v13  ;;  %v832_v25 = vld [vmem:[#allocation3 + $0x8] ss:$12 sps:$4 sm:$0xff]   ;;  %v835_v27 = vld [vmem:[#allocation3 + $0x18] ss:$12 sps:$4 sm:$0xff]   ;;  %v836_v28 = vld [vmem:[#allocation3 + $0x20] ss:$12 sps:$4 sm:$0xff]   ;;  %827 = vset.pattern.permute.xlu0 %v901_v33 }
  0x1a   :  { %v50_v4 = vadd.s32 8, %v966_v3  ;;  %v51_v5 = vadd.s32 16, %v966_v3  ;;  %v52_v6 = vadd.s32 24, %v966_v3  ;;  %v53_v7 = vadd.s32 32, %v966_v3  ;;  %v833_v26 = vld [vmem:[#allocation3 + $0x1c] ss:$12 sps:$4 sm:$0xff]   ;;  %828 = vset.pattern.permute.xlu1 %v901_v33 }
  0x1b   :  { %v54_v8 = vadd.s32 40, %v966_v3  ;;  %vm130_vm1 = vcmp.eq.s32.totalorder %v966_v3, %v976_v9  ;;  %vm69_vm3 = vcmp.eq.s32.totalorder %v966_v3, %v981_v10  ;;  %vm191_vm6 = vcmp.eq.s32.totalorder %v966_v3, %v986_v11  ;;  %v837_v29 = vld [vmem:[#allocation3 + $0x34] ss:$12 sps:$4 sm:$0xff]   ;;  %v839_v30 = vld [vmem:[#allocation3 + $0x30] ss:$12 sps:$4 sm:$0xff]   ;;  %v427_v34 = vld [vmem:[%s1138_s3 + $0x8] sm:$0xff] }
  0x1c   :  { %vm131_vm2 = vcmp.eq.s32.totalorder %v50_v4, %v976_v9  ;;  %vm70_vm4 = vcmp.eq.s32.totalorder %v50_v4, %v981_v10  ;;  %vm192_vm7 = vcmp.eq.s32.totalorder %v50_v4, %v986_v11  ;;  %vm132_vm8 = vcmp.eq.s32.totalorder %v51_v5, %v976_v9  ;;  %v840_v31 = vld [vmem:[#allocation3 + $0x38] ss:$12 sps:$4 sm:$0xff]   ;;  %v578_v36 = vld [vmem:[#allocation2] sm:$0x1] }
  0x1d   :  { %vm687_vm5 = vmpackc.low %vm131_vm2, %vm130_vm1  ;;  %vm133_vm9 = vcmp.eq.s32.totalorder %v52_v6, %v976_v9  ;;  %vm71_vm11 = vcmp.eq.s32.totalorder %v51_v5, %v981_v10  ;;  %vm72_vm12 = vcmp.eq.s32.totalorder %v52_v6, %v981_v10  ;;  %vm193_vm14 = vcmp.eq.s32.totalorder %v51_v5, %v986_v11  ;;  %v426_v32 = vld [vmem:[%s1138_s3] sm:$0xff] }
  0x1e   :  { %724 = vmatprep.subr.msk.bf16.mxu0 %vm687_vm5, %v900_v12  ;;  %vm671_vm10 = vmpackc.low %vm70_vm4, %vm69_vm3  ;;  %vm194_vm15 = vcmp.eq.s32.totalorder %v52_v6, %v986_v11  ;;  %v55_v14 = vadd.s32 48, %v966_v3  ;;  %v56_v15 = vadd.s32 56, %v966_v3  ;;  %vm134_vm2 = vcmp.eq.s32.totalorder %v53_v7, %v976_v9  ;;  %430 = vperm.xlu0 %827, %v426_v32   ;;  %v557_v35 = vld [vmem:[%s1141_s6] sm:$0xff] }
  0x1f   :  { %725 = vmatpush3.bf16.msk.msra.mxu0 %vm671_vm10, %v900_v12  ;;  %vm703_vm13 = vmpackc.low %vm192_vm7, %vm191_vm6  ;;  %vm135_vm3 = vcmp.eq.s32.totalorder %v54_v8, %v976_v9  ;;  %vm73_vm5 = vcmp.eq.s32.totalorder %v53_v7, %v981_v10  ;;  %vm74_vm6 = vcmp.eq.s32.totalorder %v54_v8, %v981_v10  ;;  %vm195_vm10 = vcmp.eq.s32.totalorder %v53_v7, %v986_v11 }
  0x20   :  { %776 = vmatpush3.bf16.msk.msra.mxu1 %vm703_vm13, %v900_v12  ;;  %vm689_vm1 = vmpackc.low %vm133_vm9, %vm132_vm8  ;;  %vm196_vm8 = vcmp.eq.s32.totalorder %v54_v8, %v986_v11  ;;  %v57_v16 = vadd.s32 64, %v966_v3  ;;  %v58_v17 = vadd.s32 72, %v966_v3  ;;  %vm136_vm13 = vcmp.eq.s32.totalorder %v55_v14, %v976_v9 }
  0x21   :  { %726 = vmatprep.subr.msk.bf16.mxu0 %vm689_vm1, %v900_v12  ;;  %777 = vmatprep.subr.bf16.mxu1 %v898_v2  ;;  %vm673_vm4 = vmpackc.low %vm72_vm12, %vm71_vm11  ;;  %vm137_vm11 = vcmp.eq.s32.totalorder %v56_v15, %v976_v9  ;;  %v59_v18 = vadd.s32 80, %v966_v3  ;;  %v60_v19 = vadd.s32 88, %v966_v3  ;;  %v61_v20 = vadd.s32 96, %v966_v3 }
  0x22   :  { %vm705_vm7 = vmpackc.low %vm194_vm15, %vm193_vm14  ;;  %vm75_vm14 = vcmp.eq.s32.totalorder %v55_v14, %v981_v10  ;;  %vm76_vm15 = vcmp.eq.s32.totalorder %v56_v15, %v981_v10  ;;  %vm138_vm0 = vcmp.eq.s32.totalorder %v57_v16, %v976_v9  ;;  %v62_v21 = vadd.s32 104, %v966_v3  ;;  %435 = vperm.xlu0 %827, %v427_v34  }
  0x23   :  { %727 = vmatpush3.bf16.msk.msra.mxu0 %vm673_vm4, %v900_v12  ;;  %vm691_vm9 = vmpackc.low %vm135_vm3, %vm134_vm2  ;;  %vm197_vm2 = vcmp.eq.s32.totalorder %v55_v14, %v986_v11  ;;  %vm198_vm3 = vcmp.eq.s32.totalorder %v56_v15, %v986_v11  ;;  %v63_v22 = vadd.s32 112, %v966_v3  ;;  %v64_v23 = vadd.s32 120, %v966_v3  ;;  %v841_v14 = vld [vmem:[%s1137_s2] sm:$0xff]  }
  0x24   :  { %778 = vmatpush3.bf16.msk.msra.mxu1 %vm705_vm7, %v900_v12  ;;  %728 = vmatprep.subr.msk.bf16.mxu0 %vm691_vm9, %v900_v12  ;;  %vm675_vm12 = vmpackc.low %vm74_vm6, %vm73_vm5  ;;  %vm139_vm7 = vcmp.eq.s32.totalorder %v58_v17, %v976_v9  ;;  %v493_v15 = vld [vmem:[%s1140_s5] sm:$0xff] }
  0x25   :  { %779 = vmatprep.subr.bf16.mxu1 %v898_v2  ;;  %vm707_vm1 = vmpackc.low %vm196_vm8, %vm195_vm10  ;;  %vm77_vm10 = vcmp.eq.s32.totalorder %v57_v16, %v981_v10  ;;  %vm78_vm8 = vcmp.eq.s32.totalorder %v58_v17, %v981_v10  ;;  %497 = vperm.xlu1 %828, %v493_v15  }
  0x26   :  { %vm693_vm4 = vmpackc.low %vm137_vm11, %vm136_vm13  ;;  %vm199_vm13 = vcmp.eq.s32.totalorder %v57_v16, %v986_v11  ;;  %vm200_vm11 = vcmp.eq.s32.totalorder %v58_v17, %v986_v11  ;;  %561 = vperm.xlu0 %827, %v557_v35   ;;  %v558_v16 = vld [vmem:[%s1141_s6 + $0x8] sm:$0xff] }
  0x27   :  { %729 = vmatpush3.bf16.msk.msra.mxu0 %vm675_vm12, %v900_v12  ;;  %vm677_vm5 = vmpackc.low %vm76_vm15, %vm75_vm14  ;;  %vm140_vm12 = vcmp.eq.s32.totalorder %v59_v18, %v976_v9  ;;  %vm141_vm14 = vcmp.eq.s32.totalorder %v60_v19, %v976_v9 }
  0x28   :  { %780 = vmatpush3.bf16.msk.msra.mxu1 %vm707_vm1, %v900_v12  ;;  %730 = vmatprep.subr.msk.bf16.mxu0 %vm693_vm4, %v900_v12  ;;  %vm709_vm6 = vmpackc.low %vm198_vm3, %vm197_vm2  ;;  %vm79_vm1 = vcmp.eq.s32.totalorder %v59_v18, %v981_v10  ;;  %vm80_vm2 = vcmp.eq.s32.totalorder %v60_v19, %v981_v10  ;;  %vm201_vm4 = vcmp.eq.s32.totalorder %v59_v18, %v986_v11 }
  0x29   :  { %781 = vmatprep.subr.bf16.mxu1 %v898_v2  ;;  %vm695_vm9 = vmpackc.low %vm139_vm7, %vm138_vm0  ;;  %vm202_vm7 = vcmp.eq.s32.totalorder %v60_v19, %v986_v11 }
  0x2a   :  { %vm679_vm15 = vmpackc.low %vm78_vm8, %vm77_vm10  ;;  %vm143_vm10 = vcmp.eq.s32.totalorder %v62_v21, %v976_v9  ;;  %581 = vperm.xlu0 %827, %v578_v36  }
  0x2b   :  { %731 = vmatpush3.bf16.msk.msra.mxu0 %vm677_vm5, %v900_v12  ;;  %vm711_vm0 = vmpackc.low %vm200_vm11, %vm199_vm13  ;;  %vm142_vm5 = vcmp.eq.s32.totalorder %v61_v20, %v976_v9  ;;  %vm82_vm13 = vcmp.eq.s32.totalorder %v62_v21, %v981_v10 }
  0x2c   :  { %782 = vmatpush3.bf16.msk.msra.mxu1 %vm709_vm6, %v900_v12  ;;  %732 = vmatprep.subr.msk.bf16.mxu0 %vm695_vm9, %v900_v12  ;;  %vm697_vm3 = vmpackc.low %vm141_vm14, %vm140_vm12  ;;  %vm81_vm9 = vcmp.eq.s32.totalorder %v61_v20, %v981_v10  ;;  %vm203_vm12 = vcmp.eq.s32.totalorder %v61_v20, %v986_v11  ;;  %vm204_vm14 = vcmp.eq.s32.totalorder %v62_v21, %v986_v11 }
  0x2d   :  { %783 = vmatprep.subr.bf16.mxu1 %v898_v2  ;;  %vm681_vm6 = vmpackc.low %vm80_vm2, %vm79_vm1  ;;  %vm145_vm1 = vcmp.eq.s32.totalorder %v64_v23, %v976_v9 }
  0x2e   :  { %vm713_vm8 = vmpackc.low %vm202_vm7, %vm201_vm4  ;;  %vm83_vm4 = vcmp.eq.s32.totalorder %v63_v22, %v981_v10  ;;  %vm84_vm7 = vcmp.eq.s32.totalorder %v64_v23, %v981_v10 }
  0x2f   :  { %733 = vmatpush3.bf16.msk.msra.mxu0 %vm679_vm15, %v900_v12  ;;  %vm699_vm11 = vmpackc.low %vm143_vm10, %vm142_vm5  ;;  %vm144_vm15 = vcmp.eq.s32.totalorder %v63_v22, %v976_v9  ;;  %vm205_vm5 = vcmp.eq.s32.totalorder %v63_v22, %v986_v11  ;;  %vm206_vm10 = vcmp.eq.s32.totalorder %v64_v23, %v986_v11 }
  0x30   :  { %784 = vmatpush3.bf16.msk.msra.mxu1 %vm711_vm0, %v900_v12  ;;  %734 = vmatprep.subr.msk.bf16.mxu0 %vm697_vm3, %v900_v12  ;;  %vm683_vm0 = vmpackc.low %vm82_vm13, %vm81_vm9  ;;  %vm1146_vm9 = vmmov 0   ;;  %vm443_vm13 = vcmask 392192  }
  0x31   :  { %785 = vmatprep.subr.bf16.mxu1 %v898_v2  ;;  %vm715_vm2 = vmpackc.low %vm204_vm14, %vm203_vm12 }
  0x32   :  { %vm701_vm3 = vmpackc.low %vm145_vm1, %vm144_vm15 }
  0x33   :  { %735 = vmatpush3.bf16.msk.msra.mxu0 %vm681_vm6, %v900_v12  ;;  %vm685_vm6 = vmpackc.low %vm84_vm7, %vm83_vm4 }
  0x34   :  { %786 = vmatpush3.bf16.msk.msra.mxu1 %vm713_vm8, %v900_v12  ;;  %736 = vmatprep.subr.msk.bf16.mxu0 %vm699_vm11, %v900_v12  ;;  %vm717_vm8 = vmpackc.low %vm206_vm10, %vm205_vm5  ;;  %vm510_vm11 = vcmask 130048  }
  0x35   :  { %787 = vmatprep.subr.bf16.mxu1 %v898_v2 }
  0x37   :  { %737 = vmatpush3.bf16.msk.msra.mxu0 %vm683_vm0, %v900_v12 }
  0x38   :  { %788 = vmatpush3.bf16.msk.msra.mxu1 %vm715_vm2, %v900_v12  ;;  %738 = vmatprep.subr.msk.bf16.mxu0 %vm701_vm3, %v900_v12 }
  0x39   :  { %789 = vmatprep.subr.bf16.mxu1 %v898_v2 }
  0x3b   :  { %739 = vmatpush3.bf16.msk.msra.mxu0 %vm685_vm6, %v900_v12 }
  0x3c   :  { %790 = vmatpush3.bf16.msk.msra.mxu1 %vm717_vm8, %v900_v12  ;;  %803 = vmatprep.subr.bf16.mxu0 %v898_v2 }
  0x3d   :  { %813 = vmatprep.subr.bf16.mxu1 %v898_v2 }
  0x3e   :  { %340 = vmatmul.mubr.bf16.vlgmr.msra.gmra.mrb[0].mxu0 %v829_v24 }
  0x3f   :  { %792 = vmatmul.mubr.bf16.vlgmr.msra.gmra.mrb[0].mxu1 %v832_v25  ;;  %347 = vmatprep.mubr.bf16.mxu0 %v833_v26 }
  0x40   :  { %795 = vmatprep.mubr.msk.bf16.mxu1 %vm1146_vm9, %v898_v2 }
  0x46   :  { %348 = vmatmul.mubr.bf16.gmra.mrb[4].mxu0 %v835_v27 }
  0x47   :  { %796 = vmatmul.mubr.bf16.gmra.mrb[4].mxu1 %v836_v28  ;;  %355 = vmatprep.mubr.bf16.mxu0 %v837_v29  ;;  %v842_v28 = vld [vmem:[%s1139_s4] sm:$0xff]   ;;  %s902_s4 = smov [#allocation6]  }
  0x48   :  { %799 = vmatprep.mubr.msk.bf16.mxu1 %vm1146_vm9, %v898_v2 }
  0x4e   :  { %356 = vmatmul.mubr.bf16.gmra.mrb[8].mxu0 %v839_v30 }
  0x4f   :  { %800 = vmatmul.mubr.bf16.gmra.mrb[8].mxu1 %v840_v31  ;;  %809 = vmatprep.mubr.msk.bf16.mxu0 %vm1146_vm9, %v898_v2 }
  0x50   :  { %815 = vmatprep.mubr.msk.bf16.mxu1 %vm1146_vm9, %v898_v2 }
  0x9d   :  { %v431_v17 = vpop.permute.xlu0 %430 }
  0xa1   :  { %v436_v21 = vpop.permute.xlu0 %435 }
  0xa4   :  { %v498_v29 = vpop.permute.xlu1 %497 }
 0x111   :  { %v740_v37 = vpop.f32.mrb[0].mxu0 }
 0x112   :  { %v398_v38 = vpop.f32.mrb[0].mxu1  ;;  %v741_v39 = vpop.f32.mrb[1].mxu0 }
 0x113   :  { %v742_v40 = vadd.f32 %v741_v39, %v740_v37  ;;  %v793_v41 = vpop.f32.mrb[1].mxu1  ;;  %v743_v42 = vpop.f32.mrb[2].mxu0 }
 0x114   :  { %v401_v43 = vpop.f32.mrb[2].mxu1  ;;  %v744_v44 = vpop.f32.mrb[3].mxu0 }
 0x115   :  { %v399_v45 = vadd.f32 %v742_v40, %v398_v38  ;;  %v745_v46 = vadd.f32 %v744_v44, %v743_v42  ;;  %v794_v47 = vpop.f32.mrb[3].mxu1  ;;  %v562_v39 = vpop.permute.xlu0 %561 }
 0x116   :  { %v586_v47 = vsub.s32 0, %v966_v3 }
 0x117   :  { %v402_v48 = vadd.f32 %v745_v46, %v401_v43 }
 0x119   :  { %v421_v49 = vpack.c.bf16 %v402_v48, %v399_v45  ;;  %v746_v50 = vpop.f32.mrb[4].mxu0 }
 0x11a   :  { %v406_v51 = vpop.f32.mrb[4].mxu1  ;;  %v747_v52 = vpop.f32.mrb[5].mxu0 }
 0x11b   :  { %v748_v53 = vadd.f32 %v747_v52, %v746_v50  ;;  %v797_v54 = vpop.f32.mrb[5].mxu1  ;;  %v749_v55 = vpop.f32.mrb[6].mxu0  ;;  %804 = vmatpush3.bf16.msra.mxu0 %v421_v49 }
 0x11c   :  { %v409_v56 = vpop.f32.mrb[6].mxu1  ;;  %v750_v57 = vpop.f32.mrb[7].mxu0  ;;  %805 = vmatprep.subr.bf16.mxu0 %v898_v2 }
 0x11d   :  { %v407_v58 = vadd.f32 %v748_v53, %v406_v51  ;;  %v751_v59 = vadd.f32 %v750_v57, %v749_v55  ;;  %v798_v60 = vpop.f32.mrb[7].mxu1  ;;  %v582_v49 = vpop.permute.xlu0 %581 }
 0x11e   :  { %v587_v51 = vrot.slane %v582_v49, %v586_v47 }
 0x11f   :  { %v410_v61 = vadd.f32 %v751_v59, %v409_v56 }
 0x121   :  { %v422_v62 = vpack.c.bf16 %v410_v61, %v407_v58  ;;  %v752_v63 = vpop.f32.mrb[8].mxu0 }
 0x122   :  { %v414_v0 = vpop.f32.mrb[8].mxu1  ;;  %v753_v1 = vpop.f32.mrb[9].mxu0 }
 0x123   :  { %v754_v4 = vadd.f32 %v753_v1, %v752_v63  ;;  %v801_v5 = vpop.f32.mrb[9].mxu1  ;;  %v755_v6 = vpop.f32.mrb[10].mxu0  ;;  %806 = vmatpush3.bf16.msra.mxu0 %v422_v62 }
 0x124   :  { %v417_v7 = vpop.f32.mrb[10].mxu1  ;;  %v756_v8 = vpop.f32.mrb[11].mxu0  ;;  %807 = vmatprep.subr.bf16.mxu0 %v898_v2  ;;  %v494_v2 = vld [vmem:[%s1140_s5 + $0x8] sm:$0xff]  ;;  %s602_s5 = sshll.u32 %s902_s4, 4  ;;  %s603_s5 = int_to_ptr.vmem [resolvable:$true] %s602_s5 }
 0x125   :  { %v415_v9 = vadd.f32 %v754_v4, %v414_v0  ;;  %v757_v10 = vadd.f32 %v756_v8, %v755_v6  ;;  %v802_v11 = vpop.f32.mrb[11].mxu1  ;;  %502 = vperm.xlu1 %828, %v494_v2   ;;  %s869_s6 = scalar_lea.vmem %s603_s5, 16  ;;  %s873_s7 = scalar_lea.vmem %s603_s5, 32 }
 0x126   :  { %p870_p8 = scmp.ne.s32.totalorder %s603_s5, %s869_s6  ;;  %p874_p9 = scmp.lt.s32.totalorder %s603_s5, %s603_s5 }
 0x127   :  { %v418_v12 = vadd.f32 %v757_v10, %v417_v7  ;;  %p875_p10 = scmp.lt.s32.totalorder %s873_s7, %s869_s6 }
 0x129   :  { %v423_v13 = vpack.c.bf16 %v418_v12, %v415_v9  ;;  %566 = vperm.xlu1 %828, %v558_v16   ;;  %p876_p11 = por %p875_p10, %p874_p9 }
 0x12b   :  { %808 = vmatpush3.bf16.msra.mxu0 %v423_v13  ;;  %p877_p12 = pnand %p876_p11, %p870_p8 }
 0x12e   :  { %810 = vmatmul.mubr.msk.bf16.vlgmr.msra.gmra.mrb[12].mxu0 %vm443_vm13, %v841_v14 }
 0x1a4   :  { %v503_v31 = vpop.permute.xlu1 %502 }
 0x1a8   :  { %v567_v40 = vpop.permute.xlu1 %566 }
 0x201   :  { %v481_v18 = vpop.f32.mrb[12].mxu0 }
 0x202   :  { %v482_v19 = vadd.f32 %v481_v18, %v431_v17  ;;  %v811_v20 = vpop.f32.mrb[13].mxu0 }
 0x203   :  { %v484_v22 = vpop.f32.mrb[14].mxu0 }
 0x204   :  { %v485_v23 = vadd.f32 %v484_v22, %v436_v21  ;;  %v812_v24 = vpop.f32.mrb[15].mxu0  ;;  %v488_v25 = vmax.f32 %v482_v19, 0.0 }
 0x206   :  { %v489_v26 = vmax.f32 %v485_v23, 0.0 }
 0x208   :  { %v492_v27 = vpack.c.bf16 %v489_v26, %v488_v25 }
 0x20a   :  { %814 = vmatpush3.bf16.msra.mxu1 %v492_v27 }
 0x20d   :  { %816 = vmatmul.mubr.msk.bf16.vlgmr.msra.gmra.mrb[12].mxu1 %vm510_vm11, %v842_v28 }
 0x2e0   :  { %v548_v30 = vpop.f32.mrb[12].mxu1 }
 0x2e1   :  { %v549_v32 = vadd.f32 %v548_v30, %v498_v29  ;;  %v817_v33 = vpop.f32.mrb[13].mxu1 }
 0x2e2   :  { %v551_v34 = vpop.f32.mrb[14].mxu1 }
 0x2e3   :  { %v555_v35 = vmax.f32 %v549_v32, 0.0  ;;  %v552_v36 = vadd.f32 %v551_v34, %v503_v31  ;;  %v818_v37 = vpop.f32.mrb[15].mxu1 }
 0x2e5   :  { %v556_v38 = vmax.f32 %v552_v36, 0.0  ;;  %v569_v41 = vmul.f32 %v562_v39, %v555_v35 }
 0x2e7   :  { %v570_v42 = vmul.f32 %v567_v40, %v556_v38 }
 0x2e9   :  { %v571_v43 = vadd.f32 %v570_v42, %v569_v41 }
 0x2eb   :  { %v572_v44 = vrot.slane %v571_v43, 4 }
 0x2ed   :  { %v573_v45 = vadd.f32 %v572_v44, %v571_v43 }
 0x2ef   :  { %v574_v46 = vrot.slane %v573_v45, 2 }
 0x2f1   :  { %v575_v48 = vadd.f32 %v574_v46, %v573_v45 }
 0x2f3   :  { %v576_v50 = vrot.slane %v575_v48, 1 }
 0x2f5   :  { %v577_v52 = vadd.f32 %v576_v50, %v575_v48 }
 0x2f7   :  { %v588_v53 = vadd.f32 %v587_v51, %v577_v52 }
 0x2f9   :  { %v723_v54 = vmul.f32 -1.442695, %v588_v53 }
 0x2fb   :  { %843 = vpow2.f32 %v723_v54 }
 0x305   :  { %v844_v55 = vpop.eup %843 }
 0x306   :  { %v592_v56 = vadd.f32 1.0, %v844_v55 }
 0x308   :  { %845 = vrcp.f32 %v592_v56 }
 0x312   :  { %v846_v57 = vpop.eup %845 }
 0x313   :  { %595 = vst [vmem:[#allocation6] sm:$0x1] %v846_v57 }
 0x314   :  { %880 = shalt.err (!%p877_p12)
}
 0x315   :  { %s881_s18 = scalar_lea.hbm %s1143_s8, 16 }
 0x316   :  { %p882_p13 = scmp.ne.s32.totalorder %s1143_s8, %s881_s18  ;;  %p885_p0 = scmp.lt.u32.totalorder %s881_s18, %s1143_s8 }
 0x318   :  { %p887_p1 = pnand %p885_p0, %p882_p13 }
 0x31a   :  { %890 = shalt.err (!%p887_p1)
}
 0x31b   :  { %605 = dma.vmem_to_hbm [thread:$0]  %s603_s5, 16, %s1143_s8, [#allocation5]  }
 0x31c   :  { %893 = dma.done.wait [#allocation5], 16  }
 0x31d   :  { %894 = vsyncadd [#allocation5], 4294967280 }
 0x31e   :  { %609 = vsyncpa [#allocation4], 1 }
 0x31f   :  { %610 = vsyncpa [#allocation5], 1 }

</bundles_post_ra>
